<compile_context>
chip_gen: v7x
topology: tpu7x:2x2x1
jax: 0.10.0
libtpu: 0.0.40
codegen_flags: <defaults>
</compile_context>

<pallas_src>
import functools
import math

import jax
import jax.numpy as jnp
from jax import lax
from jax.experimental import pallas as pl
from jax.experimental.pallas import tpu as pltpu

WDTYPE = jnp.bfloat16            # matmul operand dtype (weights stored in HBM like this)


def _round_up(x, m):
    return ((x + m - 1) // m) * m


def _vmem_capacity_bytes():
    try:
        return int(pltpu.get_tpu_info().vmem_capacity_bytes)
    except Exception:
        return 64 * 1024 * 1024   # safe for every listed generation


_VMEM_CAP = _vmem_capacity_bytes()
_VMEM_LIMIT = int(min(_VMEM_CAP * 3 // 4, 100 * 1024 * 1024))
_WHOLE_BLOCK_LIMIT_BYTES = int(min(_VMEM_LIMIT // 2, 48 * 1024 * 1024))
_PARAMS_WHOLE = pltpu.CompilerParams(vmem_limit_bytes=_VMEM_LIMIT)


# ---------------------------------------------------------------------------
# Matmul kernels:  y = (silu?(x)) @ w + b     (w pre-padded to 128-lane multiple)
# ---------------------------------------------------------------------------
def _mm_whole_kernel(x_ref, w_ref, b_ref, o_ref, *, input_silu):
    x = x_ref[...]
    if input_silu:
        x = x * jax.nn.sigmoid(x)
    y = jnp.dot(x.astype(w_ref.dtype), w_ref[...], preferred_element_type=jnp.float32)
    o_ref[...] = (y + b_ref[...]).astype(o_ref.dtype)


def _mm_tiled_kernel(x_ref, w_ref, b_ref, o_ref, *, input_silu):
    k = pl.program_id(2)
    x = x_ref[...]
    if input_silu:
        x = x * jax.nn.sigmoid(x)
    contrib = jnp.dot(x.astype(w_ref.dtype), w_ref[...],
                      preferred_element_type=jnp.float32)

    @pl.when(k == 0)
    def _init():
        o_ref[...] = b_ref[...] + contrib

    @pl.when(k > 0)
    def _acc():
        o_ref[...] = o_ref[...] + contrib


@functools.partial(jax.jit, static_argnames=("n_out", "input_silu", "force_tiled"))
def pallas_matmul(x, w, b, n_out, *, input_silu=False, force_tiled=False):
    """x: (M, K) f32/bf16, w: (K, Np) bf16 (Np = multiple of 128), b: (1, Np) f32."""
    M, K = x.shape
    Kw, Np = w.shape
    assert K == Kw and Np % 128 == 0, (x.shape, w.shape)
    Mp = _round_up(max(M, 8), 8)
    if Mp != M:
        x = jnp.pad(x, ((0, Mp - M), (0, 0)))
    nbytes = Mp * K * x.dtype.itemsize + K * Np * w.dtype.itemsize + Mp * Np * 4

    if (not force_tiled) and nbytes <= _WHOLE_BLOCK_LIMIT_BYTES:
        # Single-shot kernel: whole operands resident in VMEM, no grid / pipelining.
        out = pl.pallas_call(
            functools.partial(_mm_whole_kernel, input_silu=input_silu),
            out_shape=jax.ShapeDtypeStruct((Mp, Np), jnp.float32),
            compiler_params=_PARAMS_WHOLE,
        )(x, w, b)
        return out[:M, :n_out]

    # Tiled fallback (only needed for very large operands).
    tm = Mp if Mp <= 512 else 256
    Mp2 = _round_up(Mp, tm)
    if Np <= 768:
        tn = Np
    elif Np % 512 == 0:
        tn = 512
    elif Np % 384 == 0:
        tn = 384
    elif Np % 256 == 0:
        tn = 256
    else:
        tn = 128
    pad_c = min((_round_up(K, c) - K, -c) for c in (512, 384, 256, 128))
    tk = -pad_c[1]
    Kp = _round_up(K, tk)
    xp = jnp.pad(x, ((0, Mp2 - Mp), (0, Kp - K)))
    wp = jnp.pad(w, ((0, Kp - K), (0, 0)))
    out = pl.pallas_call(
        functools.partial(_mm_tiled_kernel, input_silu=input_silu),
        out_shape=jax.ShapeDtypeStruct((Mp2, Np), jnp.float32),
        grid=(Mp2 // tm, Np // tn, Kp // tk),
        in_specs=[pl.BlockSpec((tm, tk), lambda i, j, k: (i, k)),
                  pl.BlockSpec((tk, tn), lambda i, j, k: (k, j)),
                  pl.BlockSpec((1, tn), lambda i, j, k: (0, j))],
        out_specs=pl.BlockSpec((tm, tn), lambda i, j, k: (i, j)),
        compiler_params=pltpu.CompilerParams(
            dimension_semantics=("parallel", "parallel", "arbitrary"),
            vmem_limit_bytes=_VMEM_LIMIT),
    )(xp, wp, b)
    return out[:M, :n_out]


# ---------------------------------------------------------------------------
# Implicit-GEMM 3x3 stride-1 convolution (batched over N, weights VMEM-resident)
# ---------------------------------------------------------------------------
def _conv3x3_kernel(x_ref, w_ref, b_ref, o_ref, *, row_stride):
    # x_ref: (Lp, C) row-flattened spatially padded sample; w_ref: (9, C, Cop)
    # o_ref: (H*(W+2), Cop) f32 (2 garbage columns per output row, sliced off outside)
    l_out = o_ref.shape[0]
    o_ref[...] = jnp.broadcast_to(b_ref[...], o_ref.shape)
    for dy in range(3):
        for dx in range(3):
            off = dy * row_stride + dx
            xs = x_ref[off:off + l_out, :]
            o_ref[...] += jnp.dot(xs.astype(w_ref.dtype), w_ref[dy * 3 + dx],
                                  preferred_element_type=jnp.float32)


@functools.partial(jax.jit, static_argnames=("out_c",))
def _conv3x3_s1(x, w9, b, out_c):
    N, H, W, C = x.shape
    cop = w9.shape[-1]
    wp2 = W + 2
    lp = (H + 3) * wp2
    l_out = H * wp2
    # One spatial pad + flatten of the activation (vs. a 9x im2col expansion).
    xf = jnp.pad(x, ((0, 0), (1, 2), (1, 1), (0, 0))).reshape(N, lp, C)
    y = pl.pallas_call(
        functools.partial(_conv3x3_kernel, row_stride=wp2),
        out_shape=jax.ShapeDtypeStruct((N, l_out, cop), jnp.float32),
        grid=(N,),
        in_specs=[
            pl.BlockSpec((None, lp, C), lambda n: (n, 0, 0)),
            pl.BlockSpec((9, C, cop), lambda n: (0, 0, 0)),
            pl.BlockSpec((1, cop), lambda n: (0, 0)),
        ],
        out_specs=pl.BlockSpec((None, l_out, cop), lambda n: (n, 0, 0)),
        compiler_params=pltpu.CompilerParams(
            dimension_semantics=("parallel",),
            vmem_limit_bytes=_VMEM_LIMIT),
    )(xf, w9, b)
    return y.reshape(N, H, wp2, cop)[:, :, :W, :out_c]


def _im2col3x3(x, stride):
    # x: (N, H, W, C) -> (N, Ho, Wo, 9*C); patch element order is (dy, dx, c).
    N, H, W, C = x.shape
    Ho = (H + 2 - 3) // stride + 1
    Wo = (W + 2 - 3) // stride + 1
    xp = jnp.pad(x, ((0, 0), (1, 1), (1, 1), (0, 0)))
    cols = []
    for dy in range(3):
        for dx in range(3):
            cols.append(xp[:, dy:dy + stride * (Ho - 1) + 1:stride,
                           dx:dx + stride * (Wo - 1) + 1:stride, :])
    return jnp.concatenate(cols, axis=-1), Ho, Wo


def conv2d(x_nhwc, p, *, stride=1):
    N, H, W, C = x_nhwc.shape
    out_c = p["out_c"]
    if p["k"] == 1:
        y = pallas_matmul(x_nhwc.reshape(N * H * W, C), p["w"], p["b"], out_c)
        return y.reshape(N, H, W, out_c)
    cop = p["w9"].shape[-1]
    vmem_est = 2 * ((H + 3) * (W + 2) * C * 4 + H * (W + 2) * cop * 4) + 2 * 9 * C * cop * 2
    if stride == 1 and C >= 8 and vmem_est <= _VMEM_LIMIT:
        return _conv3x3_s1(x_nhwc, p["w9"], p["b"], out_c)
    # Fallback: wrapper-side im2col with bf16 patches + (tiled-capable) matmul.
    patches, Ho, Wo = _im2col3x3(x_nhwc.astype(WDTYPE), stride)
    y = pallas_matmul(patches.reshape(N * Ho * Wo, 9 * C),
                      p["w9"].reshape(9 * C, cop), p["b"], out_c)
    return y.reshape(N, Ho, Wo, out_c)


# ---------------------------------------------------------------------------
# GroupNorm (+ optional per-channel time bias before stats, + optional SiLU),
# batched over the leading grid axis; one-hot group matrices stay VMEM-resident.
# ---------------------------------------------------------------------------
def _gn_kernel(x_ref, tb_ref, g_ref, b_ref, oh_ref, oht_ref, o_ref, *,
               eps, silu, inv_count):
    x = x_ref[...].astype(jnp.float32) + tb_ref[...]           # (HW, C)
    s1 = jnp.sum(x, axis=0, keepdims=True)                     # (1, C)
    mean_g = jnp.dot(s1, oh_ref[...], preferred_element_type=jnp.float32) * inv_count
    mean_c = jnp.dot(mean_g, oht_ref[...], preferred_element_type=jnp.float32)
    xc = x - mean_c                                            # centered two-pass variance
    s2 = jnp.sum(xc * xc, axis=0, keepdims=True)
    var_g = jnp.dot(s2, oh_ref[...], preferred_element_type=jnp.float32) * inv_count
    rstd_c = jnp.dot(lax.rsqrt(var_g + eps), oht_ref[...],
                     preferred_element_type=jnp.float32)
    y = xc * rstd_c * g_ref[...] + b_ref[...]
    if silu:
        y = y * jax.nn.sigmoid(y)
    o_ref[...] = y.astype(o_ref.dtype)


@functools.partial(jax.jit, static_argnames=("groups", "eps", "silu"))
def pallas_groupnorm(x3d, tbias, gamma, beta, *, groups=32, eps=1e-5, silu=False):
    N, HW, C = x3d.shape
    assert C % groups == 0
    cpg = C // groups
    oh = (jnp.arange(C)[:, None] // cpg == jnp.arange(groups)[None, :]).astype(jnp.float32)
    inv_count = 1.0 / float(HW * cpg)
    return pl.pallas_call(
        functools.partial(_gn_kernel, eps=eps, silu=silu, inv_count=inv_count),
        out_shape=jax.ShapeDtypeStruct((N, HW, C), jnp.float32),
        grid=(N,),
        in_specs=[
            pl.BlockSpec((None, HW, C), lambda n: (n, 0, 0)),
            pl.BlockSpec((None, 1, C), lambda n: (n, 0, 0)),
            pl.BlockSpec((1, C), lambda n: (0, 0)),
            pl.BlockSpec((1, C), lambda n: (0, 0)),
            pl.BlockSpec((C, groups), lambda n: (0, 0)),
            pl.BlockSpec((groups, C), lambda n: (0, 0)),
        ],
        out_specs=pl.BlockSpec((None, HW, C), lambda n: (n, 0, 0)),
        compiler_params=pltpu.CompilerParams(
            dimension_semantics=("parallel",),
            vmem_limit_bytes=_VMEM_LIMIT),
    )(x3d, tbias, gamma.reshape(1, C), beta.reshape(1, C), oh, oh.T)


# ---------------------------------------------------------------------------
# Fused LayerNorm + multi-head self-attention + residual, batched over N.
# ---------------------------------------------------------------------------
def _layernorm(x, g, b, eps=1e-5):
    mu = jnp.mean(x, axis=-1, keepdims=True)
    xc = x - mu
    var = jnp.mean(xc * xc, axis=-1, keepdims=True)
    return xc * lax.rsqrt(var + eps) * g + b


def _attn_kernel(x_ref, g_ref, b_ref, wq_ref, wk_ref, wv_ref, wo_ref, bo_ref, o_ref,
                 *, n_heads, scale):
    x = x_ref[...]                                             # (S, C) = residue_short
    xn = _layernorm(x, g_ref[...], b_ref[...])
    xnb = xn.astype(wq_ref.dtype)
    y = jnp.zeros(x.shape, jnp.float32)
    for h in range(n_heads):                                   # unrolled, K=C projections
        q = jnp.dot(xnb, wq_ref[h], preferred_element_type=jnp.float32)    # (S, d)
        k = jnp.dot(xnb, wk_ref[h], preferred_element_type=jnp.float32)
        v = jnp.dot(xnb, wv_ref[h], preferred_element_type=jnp.float32)
        s = lax.dot_general(q, k, (((1,), (1,)), ((), ())),
                            preferred_element_type=jnp.float32) * scale    # (S, S)
        s = s - jnp.max(s, axis=-1, keepdims=True)
        p = jnp.exp(s)
        p = p * pl.reciprocal(jnp.sum(p, axis=-1, keepdims=True), approx=True)
        o_h = jnp.dot(p.astype(wq_ref.dtype), v.astype(wq_ref.dtype),
                      preferred_element_type=jnp.float32)                  # (S, d)
        y = y + jnp.dot(o_h.astype(wo_ref.dtype), wo_ref[h],
                        preferred_element_type=jnp.float32)                # (S, C)
    o_ref[...] = (y + bo_ref[...] + x).astype(o_ref.dtype)     # += residue_short


@functools.partial(jax.jit, static_argnames=("n_heads",))
def pallas_attention(x_seq, ln_g, ln_b, wq, wk, wv, wo, bo, *, n_heads):
    N, S, C = x_seq.shape
    d = C // n_heads
    return pl.pallas_call(
        functools.partial(_attn_kernel, n_heads=n_heads, scale=1.0 / math.sqrt(d)),
        out_shape=jax.ShapeDtypeStruct((N, S, C), jnp.float32),
        grid=(N,),
        in_specs=[
            pl.BlockSpec((None, S, C), lambda n: (n, 0, 0)),
            pl.BlockSpec((1, C), lambda n: (0, 0)),
            pl.BlockSpec((1, C), lambda n: (0, 0)),
            pl.BlockSpec((n_heads, C, d), lambda n: (0, 0, 0)),
            pl.BlockSpec((n_heads, C, d), lambda n: (0, 0, 0)),
            pl.BlockSpec((n_heads, C, d), lambda n: (0, 0, 0)),
            pl.BlockSpec((n_heads, d, C), lambda n: (0, 0, 0)),
            pl.BlockSpec((1, C), lambda n: (0, 0)),
        ],
        out_specs=pl.BlockSpec((None, S, C), lambda n: (n, 0, 0)),
        compiler_params=pltpu.CompilerParams(
            dimension_semantics=("parallel",),
            vmem_limit_bytes=_VMEM_LIMIT),
    )(x_seq, ln_g.reshape(1, C), ln_b.reshape(1, C), wq, wk, wv, wo, bo)


# ---------------------------------------------------------------------------
# Fused LayerNorm + GeGLU + residual (already batched over all N*S rows)
# ---------------------------------------------------------------------------
def _geglu_kernel(x_ref, g_ref, b_ref, w1_ref, b1_ref, w2_ref, b2_ref, o_ref):
    x = x_ref[...]                                             # (M, C) = residue_short
    xn = _layernorm(x, g_ref[...], b_ref[...])
    h = jnp.dot(xn.astype(w1_ref.dtype), w1_ref[...],
                preferred_element_type=jnp.float32) + b1_ref[...]          # (M, 8C)
    c4 = w2_ref.shape[0]
    a, gate = h[:, :c4], h[:, c4:]
    # TODO(synk): PyTorch F.gelu uses the exact erf form; tanh approximation used here.
    gg = 0.5 * gate * (1.0 + jnp.tanh(0.7978845608028654 *
                                      (gate + 0.044715 * gate * gate * gate)))
    z = a * gg
    y = jnp.dot(z.astype(w2_ref.dtype), w2_ref[...],
                preferred_element_type=jnp.float32) + b2_ref[...]
    o_ref[...] = (y + x).astype(o_ref.dtype)


@jax.jit
def pallas_geglu(x2d, ln_g, ln_b, w1, b1, w2, b2):
    M, C = x2d.shape
    return pl.pallas_call(
        _geglu_kernel,
        out_shape=jax.ShapeDtypeStruct((M, C), jnp.float32),
        compiler_params=_PARAMS_WHOLE,
    )(x2d, ln_g.reshape(1, C), ln_b.reshape(1, C), w1, b1, w2, b2)


# ---------------------------------------------------------------------------
# Parameter init (PyTorch layouts -> kernel-ready, bf16, pre-padded to lane multiples)
# ---------------------------------------------------------------------------
def _conv_params(w, b):
    out_c, in_c, k, _ = w.shape
    cop = _round_up(out_c, 128)
    bp = jnp.pad(b.astype(jnp.float32), (0, cop - out_c)).reshape(1, cop)
    if k == 1:
        wm = jnp.pad(w.reshape(out_c, in_c).T, ((0, 0), (0, cop - out_c))).astype(WDTYPE)
        return {"k": 1, "out_c": out_c, "w": wm, "b": bp}
    w9 = jnp.transpose(w, (2, 3, 1, 0)).reshape(9, in_c, out_c)
    w9 = jnp.pad(w9, ((0, 0), (0, 0), (0, cop - out_c))).astype(WDTYPE)
    return {"k": 3, "out_c": out_c, "w9": w9, "b": bp}


def init_conv(key, in_c, out_c, k):
    kw, kb = jax.random.split(key)
    fan_in = in_c * k * k
    w = jax.random.normal(kw, (out_c, in_c, k, k), jnp.float32) / math.sqrt(fan_in)
    b = jax.random.normal(kb, (out_c,), jnp.float32) * 0.02
    return _conv_params(w, b)


def init_linear(key, in_f, out_f, pad_out=True):
    kw, kb = jax.random.split(key)
    w = jax.random.normal(kw, (out_f, in_f), jnp.float32) / math.sqrt(in_f)
    b = jax.random.normal(kb, (out_f,), jnp.float32) * 0.02
    fp = _round_up(out_f, 128) if pad_out else out_f
    wp = jnp.pad(w.T, ((0, 0), (0, fp - out_f))).astype(WDTYPE)
    bp = jnp.pad(b, (0, fp - out_f)).reshape(1, fp)
    return {"w": wp, "b": bp, "out_f": out_f}


def init_norm(c):
    return {"g": jnp.ones((c,), jnp.float32), "b": jnp.zeros((c,), jnp.float32)}


def init_attention(key, n_heads, channels):
    d = channels // n_heads
    k1, k2, k3 = jax.random.split(key, 3)
    in_proj = jax.random.normal(k1, (3 * channels, channels), jnp.float32) / math.sqrt(channels)
    out_w = jax.random.normal(k2, (channels, channels), jnp.float32) / math.sqrt(channels)
    out_b = jax.random.normal(k3, (channels,), jnp.float32) * 0.02
    wq = jnp.stack([in_proj[h * d:(h + 1) * d, :].T for h in range(n_heads)])
    wk = jnp.stack([in_proj[channels + h * d:channels + (h + 1) * d, :].T
                    for h in range(n_heads)])
    wv = jnp.stack([in_proj[2 * channels + h * d:2 * channels + (h + 1) * d, :].T
                    for h in range(n_heads)])
    wo = jnp.stack([out_w[:, h * d:(h + 1) * d].T for h in range(n_heads)])
    return {"wq": wq.astype(WDTYPE), "wk": wk.astype(WDTYPE), "wv": wv.astype(WDTYPE),
            "wo": wo.astype(WDTYPE), "bo": out_b.reshape(1, channels), "n_heads": n_heads}


def init_attention_block(key, n_heads, channels):
    ks = jax.random.split(key, 5)
    return {"gn": init_norm(channels),
            "conv_in": init_conv(ks[0], channels, channels, 1),
            "ln1": init_norm(channels),
            "attn": init_attention(ks[1], n_heads, channels),
            "ln2": init_norm(channels),
            "geglu1": init_linear(ks[2], channels, 8 * channels, pad_out=False),
            "geglu2": init_linear(ks[3], 4 * channels, channels, pad_out=False),
            "conv_out": init_conv(ks[4], channels, channels, 1)}


def init_residual_block(key, in_c, out_c, n_time=640):
    ks = jax.random.split(key, 4)
    p = {"gn1": init_norm(in_c),
         "conv1": init_conv(ks[0], in_c, out_c, 3),
         "lin_time": init_linear(ks[1], n_time, out_c),
         "gn2": init_norm(out_c),
         "conv2": init_conv(ks[2], out_c, out_c, 3)}
    if in_c != out_c:
        p["shortcut"] = init_conv(ks[3], in_c, out_c, 1)
    return p


# ---------------------------------------------------------------------------
# Block application
# ---------------------------------------------------------------------------
def apply_groupnorm(x_nhwc, gn, *, eps, silu, tbias=None):
    N, H, W, C = x_nhwc.shape
    tb = jnp.zeros((N, 1, C), jnp.float32) if tbias is None else tbias.reshape(N, 1, C)
    y = pallas_groupnorm(x_nhwc.reshape(N, H * W, C), tb, gn["g"], gn["b"],
                         groups=32, eps=eps, silu=silu)
    return y.reshape(N, H, W, C)


def apply_residual_block(p, x, time):
    residue = x
    h = apply_groupnorm(x, p["gn1"], eps=1e-5, silu=True)
    h = conv2d(h, p["conv1"], stride=1)
    t = pallas_matmul(time, p["lin_time"]["w"], p["lin_time"]["b"],
                      p["lin_time"]["out_f"], input_silu=True)
    m = apply_groupnorm(h, p["gn2"], eps=1e-5, silu=True, tbias=t)
    m = conv2d(m, p["conv2"], stride=1)
    if "shortcut" in p:
        residue = conv2d(residue, p["shortcut"], stride=1)
    return m + residue


def apply_attention_block(p, x):
    N, H, W, C = x.shape
    residue_long = x
    h = apply_groupnorm(x, p["gn"], eps=1e-6, silu=False)
    h = conv2d(h, p["conv_in"], stride=1)
    seq = h.reshape(N, H * W, C)
    seq = pallas_attention(seq, p["ln1"]["g"], p["ln1"]["b"],
                           p["attn"]["wq"], p["attn"]["wk"], p["attn"]["wv"],
                           p["attn"]["wo"], p["attn"]["bo"],
                           n_heads=p["attn"]["n_heads"])
    h2 = pallas_geglu(seq.reshape(N * H * W, C), p["ln2"]["g"], p["ln2"]["b"],
                      p["geglu1"]["w"], p["geglu1"]["b"],
                      p["geglu2"]["w"], p["geglu2"]["b"])
    h = conv2d(h2.reshape(N, H, W, C), p["conv_out"], stride=1)
    return h + residue_long


def apply_upsample(conv_p, x):
    x = jnp.repeat(jnp.repeat(x, 2, axis=1), 2, axis=2)
    return conv2d(x, conv_p, stride=1)


# ---------------------------------------------------------------------------
# UNet wiring (same topology / channel counts as the PyTorch module)
# ---------------------------------------------------------------------------
ENC_CFG = [("conv", 1, 160),
           ("ra", 160, 160, 8), ("ra", 160, 160, 8),
           ("down", 160),
           ("ra", 160, 320, 8), ("ra", 320, 320, 8),
           ("down", 320),
           ("ra", 320, 640, 8), ("ra", 640, 640, 8),
           ("down", 640),
           ("r", 640, 640), ("r", 640, 640)]
BOT_CFG = [("r", 640, 640), ("a", 640, 8), ("r", 640, 640)]
DEC_CFG = [("r", 1280, 640), ("r", 1280, 640), ("r_up", 1280, 640),
           ("ra", 1280, 640, 8), ("ra", 1280, 640, 8), ("ra_up", 960, 640, 8),
           ("ra", 960, 320, 8), ("ra", 640, 320, 8), ("ra_up", 480, 320, 8),
           ("ra", 480, 160, 8), ("ra", 320, 160, 8), ("ra", 320, 160, 8)]


def init_unet(key):
    state = {"key": key}

    def take():
        state["key"], sub = jax.random.split(state["key"])
        return sub

    params = {"encoders": [], "bottleneck": [], "decoders": []}
    for cfg in ENC_CFG:
        kind = cfg[0]
        if kind == "conv":
            params["encoders"].append({"kind": "conv", "conv": init_conv(take(), cfg[1], cfg[2], 3)})
        elif kind == "down":
            params["encoders"].append({"kind": "down", "conv": init_conv(take(), cfg[1], cfg[1], 3)})
        else:
            entry = {"kind": kind, "res": init_residual_block(take(), cfg[1], cfg[2])}
            if kind.startswith("ra"):
                entry["attn"] = init_attention_block(take(), cfg[3], cfg[2])
            params["encoders"].append(entry)
    for cfg in BOT_CFG:
        if cfg[0] == "r":
            params["bottleneck"].append({"kind": "r", "res": init_residual_block(take(), cfg[1], cfg[2])})
        else:
            params["bottleneck"].append({"kind": "a", "attn": init_attention_block(take(), cfg[2], cfg[1])})
    for cfg in DEC_CFG:
        kind, in_c, out_c = cfg[0], cfg[1], cfg[2]
        entry = {"kind": kind, "res": init_residual_block(take(), in_c, out_c)}
        if kind.startswith("ra"):
            entry["attn"] = init_attention_block(take(), cfg[3], out_c)
        if kind.endswith("_up"):
            entry["up"] = init_conv(take(), out_c, out_c, 3)
        params["decoders"].append(entry)
    return params


def apply_stage(entry, x, time):
    kind = entry["kind"]
    if kind == "conv":
        return conv2d(x, entry["conv"], stride=1)
    if kind == "down":
        return conv2d(x, entry["conv"], stride=2)
    x = apply_residual_block(entry["res"], x, time)
    if "attn" in entry:
        x = apply_attention_block(entry["attn"], x)
    if "up" in entry:
        x = apply_upsample(entry["up"], x)
    return x


def unet_forward(params, x_nchw, time):
    x = jnp.transpose(x_nchw, (0, 2, 3, 1)).astype(jnp.float32)   # NHWC internally
    skips = []
    for entry in params["encoders"]:
        x = apply_stage(entry, x, time)
        skips.append(x)
    for entry in params["bottleneck"]:
        if entry["kind"] == "r":
            x = apply_residual_block(entry["res"], x, time)
        else:
            x = apply_attention_block(entry["attn"], x)
    for entry in params["decoders"]:
        x = jnp.concatenate([x, skips.pop()], axis=-1)
        x = apply_stage(entry, x, time)
    return jnp.transpose(x, (0, 3, 1, 2))                          # back to NCHW


# ---------------------------------------------------------------------------
# Self-checks (small shapes, pure-jnp references; bf16 operands => loose tolerance)
# ---------------------------------------------------------------------------
def _rel_err(a, b):
    a = jnp.asarray(a, jnp.float32)
    b = jnp.asarray(b, jnp.float32)
    return float(jnp.max(jnp.abs(a - b)) / (jnp.max(jnp.abs(b)) + 1e-6))


def _ref_layernorm(x, g, b, eps=1e-5):
    mu = jnp.mean(x, axis=-1, keepdims=True)
    var = jnp.mean((x - mu) ** 2, axis=-1, keepdims=True)
    return (x - mu) / jnp.sqrt(var + eps) * g + b


def _prep_weight(w, b):
    K, N = w.shape
    np_ = _round_up(N, 128)
    wp = jnp.pad(w, ((0, 0), (0, np_ - N))).astype(WDTYPE)
    bp = jnp.pad(b.astype(jnp.float32), (0, np_ - N)).reshape(1, np_)
    return wp, bp


def run_self_checks(key):
    kit = iter(jax.random.split(key, 32))

    # 1) whole-array matmul path (+ fused input SiLU)
    x = jax.random.normal(next(kit), (37, 200), jnp.float32)
    w = jax.random.normal(next(kit), (200, 96), jnp.float32) / math.sqrt(200)
    b = jax.random.normal(next(kit), (96,), jnp.float32) * 0.1
    wp, bp = _prep_weight(w, b)
    got = pallas_matmul(x, wp, bp, 96, input_silu=True)
    ref = (x * jax.nn.sigmoid(x)) @ w + b
    assert _rel_err(got, ref) < 4e-2, "matmul (whole) mismatch"

    # 2) tiled matmul path (forced), output-resident f32 accumulation
    x = jax.random.normal(next(kit), (130, 700), jnp.float32) * 0.1
    w = jax.random.normal(next(kit), (700, 384), jnp.float32) / math.sqrt(700)
    b = jax.random.normal(next(kit), (384,), jnp.float32) * 0.1
    wp, bp = _prep_weight(w, b)
    got = pallas_matmul(x, wp, bp, 384, force_tiled=True)
    assert _rel_err(got, x @ w + b) < 4e-2, "matmul (tiled) mismatch"

    # 3) conv3x3: implicit-GEMM stride-1 path and im2col stride-2 path vs lax.conv
    for (hh, ww, cc, oc, stride) in ((8, 8, 16, 24, 1), (4, 4, 32, 40, 1), (8, 8, 16, 24, 2)):
        xc = jax.random.normal(next(kit), (2, hh, ww, cc), jnp.float32)
        wt = jax.random.normal(next(kit), (oc, cc, 3, 3), jnp.float32) / math.sqrt(cc * 9)
        bt = jax.random.normal(next(kit), (oc,), jnp.float32) * 0.1
        cp = _conv_params(wt, bt)
        ref = lax.conv_general_dilated(xc, wt, (stride, stride), ((1, 1), (1, 1)),
                                       dimension_numbers=("NHWC", "OIHW", "NHWC")) + bt
        got = conv2d(xc, cp, stride=stride)
        assert _rel_err(got, ref) < 4e-2, f"conv mismatch {(hh, ww, cc, oc, stride)}"

    # 4) batched groupnorm (+time bias, +silu), centered variance
    xg = jax.random.normal(next(kit), (2, 48, 64), jnp.float32) * 2.0 + 0.5
    tb = jax.random.normal(next(kit), (2, 1, 64), jnp.float32)
    gamma = 1.0 + 0.1 * jax.random.normal(next(kit), (64,), jnp.float32)
    beta = 0.1 * jax.random.normal(next(kit), (64,), jnp.float32)
    got = pallas_groupnorm(xg, tb, gamma, beta, groups=32, eps=1e-5, silu=True)
    xt = (xg + tb).reshape(2, 48, 32, 2)
    mu = jnp.mean(xt, axis=(1, 3), keepdims=True)
    var = jnp.mean((xt - mu) ** 2, axis=(1, 3), keepdims=True)
    y = ((xt - mu) / jnp.sqrt(var + 1e-5)).reshape(2, 48, 64) * gamma + beta
    assert _rel_err(got, y * jax.nn.sigmoid(y)) < 2e-3, "groupnorm mismatch"

    # 5) batched fused LN + attention + residual
    C, nh = 64, 8
    ap = init_attention(next(kit), nh, C)
    ln = init_norm(C)
    xs = jax.random.normal(next(kit), (2, 16, C), jnp.float32)
    got = pallas_attention(xs, ln["g"], ln["b"], ap["wq"], ap["wk"], ap["wv"],
                           ap["wo"], ap["bo"], n_heads=nh)
    d = C // nh
    for n in range(2):
        xn = _ref_layernorm(xs[n], ln["g"], ln["b"])
        yr = jnp.zeros((16, C), jnp.float32)
        for h in range(nh):
            q = xn @ ap["wq"][h].astype(jnp.float32)
            k = xn @ ap["wk"][h].astype(jnp.float32)
            v = xn @ ap["wv"][h].astype(jnp.float32)
            pr = jax.nn.softmax(q @ k.T / math.sqrt(d), axis=-1)
            yr = yr + (pr @ v) @ ap["wo"][h].astype(jnp.float32)
        assert _rel_err(got[n], yr + ap["bo"][0] + xs[n]) < 4e-2, "attention mismatch"

    # 6) fused LN + GeGLU + residual
    g1 = init_linear(next(kit), C, 8 * C, pad_out=False)
    g2 = init_linear(next(kit), 4 * C, C, pad_out=False)
    ln2 = init_norm(C)
    xg2 = jax.random.normal(next(kit), (24, C), jnp.float32)
    got = pallas_geglu(xg2, ln2["g"], ln2["b"], g1["w"], g1["b"], g2["w"], g2["b"])
    xn = _ref_layernorm(xg2, ln2["g"], ln2["b"])
    hh = xn @ g1["w"].astype(jnp.float32) + g1["b"]
    a, gate = hh[:, :4 * C], hh[:, 4 * C:]
    gg = 0.5 * gate * (1.0 + jnp.tanh(0.7978845608028654 * (gate + 0.044715 * gate ** 3)))
    ref = (a * gg) @ g2["w"].astype(jnp.float32) + g2["b"] + xg2
    assert _rel_err(got, ref) < 4e-2, "geglu mismatch"


# ---------------------------------------------------------------------------
if __name__ == "__main__":
    key = jax.random.PRNGKey(0)
    k_checks, k_params, k_x, k_t = jax.random.split(key, 4)

    run_self_checks(k_checks)

    params = init_unet(k_params)
    N, H, W = 2, 16, 16
    x = jax.random.normal(k_x, (N, 1, H, W), jnp.float32)
    time = jax.random.normal(k_t, (N, 640), jnp.float32)

    out = unet_forward(params, x, time)
    out = jax.block_until_ready(out)

    assert out.shape == (N, 160, H, W), out.shape
    assert bool(jnp.all(jnp.isfinite(out))), "non-finite values in UNet output"
    print("KERNEL_OK")
</pallas_src>

<mosaic_0001>
module attributes {stable_mosaic.version = 11 : i64} {
  func.func @_mm_whole_kernel(%arg0: memref<40x200xf32, #tpu.memory_space<vmem>>, %arg1: memref<200x128xbf16, #tpu.memory_space<vmem>>, %arg2: memref<1x128xf32, #tpu.memory_space<vmem>>, %arg3: memref<40x128xf32, #tpu.memory_space<vmem>>) attributes {dimension_semantics = [], scalar_prefetch = 0 : i64, scratch_operands = 0 : i64, tpu.core_type = #tpu.core_type<tc>} {
    %c0 = arith.constant 0 : index
    %c0_0 = arith.constant 0 : index
    %0 = vector.load %arg0[%c0, %c0_0] : memref<40x200xf32, #tpu.memory_space<vmem>>, vector<40x200xf32>
    %1 = arith.negf %0 : vector<40x200xf32>
    %2 = math.exp %1 : vector<40x200xf32>
    %cst = arith.constant 1.000000e+00 : f32
    %3 = vector.broadcast %cst : f32 to vector<40x200xf32>
    %4 = arith.addf %3, %2 : vector<40x200xf32>
    %5 = arith.divf %3, %4 : vector<40x200xf32>
    %6 = arith.mulf %0, %5 : vector<40x200xf32>
    %7 = arith.truncf %6 : vector<40x200xf32> to vector<40x200xbf16>
    %c0_1 = arith.constant 0 : index
    %c0_2 = arith.constant 0 : index
    %8 = vector.load %arg1[%c0_1, %c0_2] : memref<200x128xbf16, #tpu.memory_space<vmem>>, vector<200x128xbf16>
    %cst_3 = arith.constant dense<0.000000e+00> : vector<40x128xf32>
    %9 = tpu.matmul %7, %8, %cst_3 {dimension_numbers = #tpu.dot_dimension_numbers<[1], [0], [0], [1], [0, 0, 1, 1], [], []>} : vector<40x200xbf16>, vector<200x128xbf16>, vector<40x128xf32> -> vector<40x128xf32>
    %c0_4 = arith.constant 0 : index
    %c0_5 = arith.constant 0 : index
    %10 = vector.load %arg2[%c0_4, %c0_5] : memref<1x128xf32, #tpu.memory_space<vmem>>, vector<1x128xf32>
    %11 = vector.broadcast %10 : vector<1x128xf32> to vector<40x128xf32>
    %12 = arith.addf %9, %11 : vector<40x128xf32>
    %c0_6 = arith.constant 0 : index
    %c0_7 = arith.constant 0 : index
    %13 = vector.load %arg3[%c0_6, %c0_7] : memref<40x128xf32, #tpu.memory_space<vmem>>, vector<40x128xf32>
    tpu.vector_store %arg3[%c0_6, %c0_7], %12 {strides = array<i32>} : memref<40x128xf32, #tpu.memory_space<vmem>>, vector<40x128xf32>,
    return
  }
}

</mosaic_0001>

<bundles_post_ra>
// kernel: pallas_matmul.1
= control target key start
LH: loop header
LB: loop body
LE: loop exit
PB: predicated region body
PF: predicated region fallthrough
CT: control target
= control target key end

     0   :  { %v434_v1 = vmov 0   ;;  %s611_s0 = inlined_call_operand.vmem [shape: f32[40,200], index: 0, kind: input, shape index: {}]   ;;  %s612_s1 = inlined_call_operand.vmem [shape: bf16[200,128], index: 1, kind: input, shape index: {}]   ;;  %s613_s2 = inlined_call_operand.vmem [shape: f32[1,128], index: 2, kind: input, shape index: {}]   ;;  %s614_s3 = inlined_call_operand.hbm [shape: f32[40,128], index: 3, kind: output, shape index: {}]  }
   0x1   :  { %v357_v0 = vld [vmem:[%s612_s1] sm:$0xff]   ;;  %327 = vmatprep.subr.bf16.mxu1 %v434_v1  ;;  %223 = vmatprep.subr.bf16.mxu0 %v434_v1  ;;  %v358_v2 = vld [vmem:[%s612_s1 + $0x8] sm:$0xff]   ;;  %v359_v3 = vld [vmem:[%s612_s1 + $0x10] sm:$0xff]  }
   0x2   :  { %340 = vmatpush1.bf16.msra.mxu1 %v357_v0  ;;  %224 = vmatpush1.bf16.msra.mxu0 %v357_v0  ;;  %v360_v4 = vld [vmem:[%s612_s1 + $0x18] sm:$0xff]   ;;  %v481_v5 = vld [vmem:[%s611_s0 + $0x28] sm:$0xff]  ;;  %v492_v8 = vld [vmem:[%s611_s0 + $0x20] sm:$0xff] }
   0x3   :  { %328 = vmatprep.subr.bf16.mxu1 %v434_v1  ;;  %225 = vmatprep.subr.bf16.mxu0 %v434_v1  ;;  %v486_v6 = vld [vmem:[%s611_s0 + $0x38] sm:$0xff]  ;;  %v305_v7 = vmul.f32 -1.442695, %v481_v5  ;;  %v497_v9 = vld [vmem:[%s611_s0 + $0x30] sm:$0xff]  ;;  %v361_v10 = vld [vmem:[%s612_s1 + $0x20] sm:$0xff]  }
   0x4   :  { %v307_v11 = vmul.f32 -1.442695, %v486_v6  ;;  %v304_v12 = vmul.f32 -1.442695, %v492_v8  ;;  %v507_v13 = vld [vmem:[%s611_s0 + $0x8] sm:$0xff]  ;;  %v515_v15 = vld [vmem:[%s611_s0 + $0x18] sm:$0xff] }
   0x5   :  { %370 = vpow2.f32 %v305_v7  ;;  %v306_v14 = vmul.f32 -1.442695, %v497_v9  ;;  %v301_v16 = vmul.f32 -1.442695, %v507_v13  ;;  %v521_v17 = vld [vmem:[%s611_s0] sm:$0xff]  ;;  %v527_v19 = vld [vmem:[%s611_s0 + $0x10] sm:$0xff] }
   0x6   :  { %341 = vmatpush1.bf16.msra.mxu1 %v358_v2  ;;  %226 = vmatpush1.bf16.msra.mxu0 %v358_v2  ;;  %372 = vpow2.f32 %v307_v11  ;;  %v303_v18 = vmul.f32 -1.442695, %v515_v15  ;;  %v532_v20 = vld [vmem:[%s611_s0 + $0x48] sm:$0xff]  ;;  %v300_v21 = vmul.f32 -1.442695, %v521_v17  ;;  %v538_v22 = vld [vmem:[%s611_s0 + $0x40] sm:$0xff] }
   0x7   :  { %329 = vmatprep.subr.bf16.mxu1 %v434_v1  ;;  %227 = vmatprep.subr.bf16.mxu0 %v434_v1  ;;  %374 = vpow2.f32 %v304_v12  ;;  %v362_v23 = vld [vmem:[%s612_s1 + $0x28] sm:$0xff]   ;;  %v302_v24 = vmul.f32 -1.442695, %v527_v19 }
   0x8   :  { %376 = vpow2.f32 %v306_v14 }
   0xa   :  { %342 = vmatpush1.bf16.msra.mxu1 %v359_v3  ;;  %228 = vmatpush1.bf16.msra.mxu0 %v359_v3 }
   0xb   :  { %330 = vmatprep.subr.bf16.mxu1 %v434_v1  ;;  %229 = vmatprep.subr.bf16.mxu0 %v434_v1 }
   0xe   :  { %343 = vmatpush1.bf16.msra.mxu1 %v360_v4  ;;  %230 = vmatpush1.bf16.msra.mxu0 %v360_v4 }
   0xf   :  { %331 = vmatprep.subr.bf16.mxu1 %v434_v1  ;;  %231 = vmatprep.subr.bf16.mxu0 %v434_v1 }
  0x12   :  { %344 = vmatpush1.bf16.msra.mxu1 %v361_v10  ;;  %232 = vmatpush1.bf16.msra.mxu0 %v361_v10 }
  0x13   :  { %8 = vsyncpa [#allocation3], 0  ;;  %332 = vmatprep.subr.bf16.mxu1 %v434_v1  ;;  %233 = vmatprep.subr.bf16.mxu0 %v434_v1  ;;  %378 = vpow2.f32 %v301_v16  ;;  %v309_v25 = vmul.f32 -1.442695, %v532_v20  ;;  %v308_v26 = vmul.f32 -1.442695, %v538_v22  ;;  %v371_v28 = vpop.eup %370 }
  0x14   :  { %380 = vpow2.f32 %v303_v18  ;;  %v363_v27 = vld [vmem:[%s612_s1 + $0x30] sm:$0xff]   ;;  %v373_v29 = vpop.eup %372  ;;  %v364_v30 = vld [vmem:[%s612_s1 + $0x38] sm:$0xff]   ;;  %v61_v31 = vadd.f32 1.0, %v371_v28  ;;  %v365_v39 = vld [vmem:[%s612_s1 + $0x40] sm:$0xff]   ;;  %vm209_vm0 = vcmask 588800   ;;  %vm219_vm1 = vcmask 1043456  }
  0x15   :  { %382 = vpow2.f32 %v300_v21  ;;  %v375_v32 = vpop.eup %374  ;;  %v63_v33 = vadd.f32 1.0, %v373_v29  ;;  %v366_v48 = vld [vmem:[%s612_s1 + $0x48] sm:$0xff]   ;;  %v367_v52 = vld [vmem:[%s612_s1 + $0x50] sm:$0xff]   ;;  %v368_v59 = vld [vmem:[%s612_s1 + $0x58] sm:$0xff]   ;;  %s435_s4 = smov [#allocation2]  }
  0x16   :  { %345 = vmatpush1.bf16.msra.mxu1 %v362_v23  ;;  %234 = vmatpush1.bf16.msra.mxu0 %v362_v23  ;;  %384 = vpow2.f32 %v302_v24  ;;  %v377_v34 = vpop.eup %376  ;;  %v60_v35 = vadd.f32 1.0, %v375_v32  ;;  %v369_v62 = vld [vmem:[%s612_s1 + $0x60] ss:$0 sps:$4 sm:$0xff]   ;;  %s289_s5 = sshll.u32 %s435_s4, 4  ;;  %s290_s5 = int_to_ptr.vmem [resolvable:$true] %s289_s5 }
  0x17   :  { %333 = vmatprep.subr.bf16.mxu1 %v434_v1  ;;  %235 = vmatprep.subr.bf16.mxu0 %v434_v1  ;;  %386 = vpow2.f32 %v309_v25  ;;  %v62_v37 = vadd.f32 1.0, %v377_v34  ;;  %v221_v12 = vsel %vm219_vm1, %v369_v62, 0  ;;  %p415_p1 = scmp.lt.s32.totalorder %s290_s5, %s290_s5 }
  0x18   :  { %388 = vpow2.f32 %v308_v26 }
  0x19   :  { %390 = vrcp.f32 %v61_v31 }
  0x1a   :  { %346 = vmatpush1.bf16.msra.mxu1 %v363_v27  ;;  %236 = vmatpush1.bf16.msra.mxu0 %v363_v27  ;;  %392 = vrcp.f32 %v63_v33 }
  0x1b   :  { %334 = vmatprep.subr.bf16.mxu1 %v434_v1  ;;  %237 = vmatprep.subr.bf16.mxu0 %v434_v1  ;;  %394 = vrcp.f32 %v60_v35 }
  0x1c   :  { %396 = vrcp.f32 %v62_v37 }
  0x1d   :  { %v379_v36 = vpop.eup %378 }
  0x1e   :  { %v381_v38 = vpop.eup %380  ;;  %347 = vmatpush1.bf16.msra.mxu1 %v364_v30  ;;  %238 = vmatpush1.bf16.msra.mxu0 %v364_v30  ;;  %v57_v40 = vadd.f32 1.0, %v379_v36 }
  0x1f   :  { %v383_v41 = vpop.eup %382  ;;  %335 = vmatprep.subr.bf16.mxu1 %v434_v1  ;;  %239 = vmatprep.subr.bf16.mxu0 %v434_v1  ;;  %v59_v42 = vadd.f32 1.0, %v381_v38 }
  0x20   :  { %v385_v43 = vpop.eup %384  ;;  %398 = vrcp.f32 %v57_v40  ;;  %v56_v44 = vadd.f32 1.0, %v383_v41 }
  0x21   :  { %v387_v45 = vpop.eup %386  ;;  %400 = vrcp.f32 %v59_v42  ;;  %v58_v46 = vadd.f32 1.0, %v385_v43 }
  0x22   :  { %v389_v47 = vpop.eup %388  ;;  %348 = vmatpush1.bf16.msra.mxu1 %v365_v39  ;;  %240 = vmatpush1.bf16.msra.mxu0 %v365_v39  ;;  %402 = vrcp.f32 %v56_v44  ;;  %v65_v49 = vadd.f32 1.0, %v387_v45 }
  0x23   :  { %336 = vmatprep.subr.bf16.mxu1 %v434_v1  ;;  %241 = vmatprep.subr.bf16.mxu0 %v434_v1  ;;  %404 = vrcp.f32 %v58_v46  ;;  %v64_v50 = vadd.f32 1.0, %v389_v47  ;;  %v391_v51 = vpop.eup %390 }
  0x24   :  { %406 = vrcp.f32 %v65_v49  ;;  %v393_v53 = vpop.eup %392  ;;  %v91_v54 = vmul.f32 %v391_v51, %v481_v5 }
  0x25   :  { %v395_v55 = vpop.eup %394  ;;  %v93_v56 = vmul.f32 %v393_v53, %v486_v6  ;;  %408 = vrcp.f32 %v64_v50 }
  0x26   :  { %349 = vmatpush1.bf16.msra.mxu1 %v366_v48  ;;  %242 = vmatpush1.bf16.msra.mxu0 %v366_v48  ;;  %v397_v57 = vpop.eup %396  ;;  %v90_v4 = vmul.f32 %v395_v55, %v492_v8 }
  0x27   :  { %337 = vmatprep.subr.bf16.mxu1 %v434_v1  ;;  %243 = vmatprep.subr.bf16.mxu0 %v434_v1  ;;  %v99_v60 = vpack.c.bf16 %v93_v56, %v91_v54  ;;  %v92_v5 = vmul.f32 %v397_v57, %v497_v9 }
  0x29   :  { %325 = vmatprep.mubr.msk.bf16.mxu1 %vm209_vm0, %v99_v60  ;;  %v98_v8 = vpack.c.bf16 %v92_v5, %v90_v4 }
  0x2a   :  { %v399_v58 = vpop.eup %398  ;;  %350 = vmatpush1.bf16.msra.mxu1 %v367_v52  ;;  %244 = vmatpush1.bf16.msra.mxu0 %v367_v52 }
  0x2b   :  { %v401_v61 = vpop.eup %400  ;;  %338 = vmatprep.subr.bf16.mxu1 %v434_v1  ;;  %245 = vmatprep.subr.bf16.mxu0 %v434_v1  ;;  %v87_v63 = vmul.f32 %v399_v58, %v507_v13 }
  0x2c   :  { %v403_v0 = vpop.eup %402  ;;  %v89_v2 = vmul.f32 %v401_v61, %v515_v15 }
  0x2d   :  { %v405_v3 = vpop.eup %404  ;;  %v86_v6 = vmul.f32 %v403_v0, %v521_v17 }
  0x2e   :  { %v407_v7 = vpop.eup %406  ;;  %351 = vmatpush1.bf16.msra.mxu1 %v368_v59  ;;  %246 = vmatpush1.bf16.msra.mxu0 %v368_v59  ;;  %v97_v10 = vpack.c.bf16 %v89_v2, %v87_v63  ;;  %v88_v11 = vmul.f32 %v405_v3, %v527_v19 }
  0x2f   :  { %339 = vmatprep.subr.bf16.mxu1 %v434_v1  ;;  %247 = vmatprep.subr.bf16.mxu0 %v434_v1  ;;  %v95_v13 = vmul.f32 %v407_v7, %v532_v20  ;;  %v409_v9 = vpop.eup %408  ;;  %v310_v1 = vld [vmem:[%s613_s2] ss:$0 sm:$0xff]  ;;  %s410_s2 = scalar_lea.vmem %s290_s5, 640 }
  0x30   :  { %324 = vmatprep.mubr.msk.bf16.mxu0 %vm209_vm0, %v97_v10  ;;  %v96_v14 = vpack.c.bf16 %v88_v11, %v86_v6  ;;  %v94_v16 = vmul.f32 %v409_v9, %v538_v22  ;;  %p411_p0 = scmp.ne.s32.totalorder %s290_s5, %s410_s2  ;;  %p416_p2 = scmp.lt.s32.totalorder %s410_s2, %s410_s2 }
  0x31   :  { %v101_v15 = vpack.c.bf16 %v95_v13, %v95_v13 }
  0x32   :  { %352 = vmatpush1.bf16.msra.mxu1 %v221_v12  ;;  %248 = vmatpush1.bf16.msra.mxu0 %v221_v12  ;;  %v100_v17 = vpack.c.bf16 %v94_v16, %v94_v16  ;;  %p417_p3 = por %p416_p2, %p415_p1 }
  0x34   :  { %p418_p4 = pnand %p417_p3, %p411_p0 }
  0x35   :  { %264 = vmatmul.mubr.bf16.vlgmr.msra.gmra.mrb[0].mxu1 %v98_v8  ;;  %256 = vmatmul.mubr.bf16.vlgmr.msra.gmra.mrb[0].mxu0 %v96_v14 }
  0x36   :  { %326 = vmatprep.mubr.msk.bf16.mxu1 %vm209_vm0, %v101_v15 }
  0x3d   :  { %272 = vmatmul.mubr.bf16.gmra.mrb[4].mxu1 %v100_v17 }
 0x108   :  { %v265_v18 = vpop.f32.mrb[0].mxu1  ;;  %v257_v19 = vpop.f32.mrb[0].mxu0 }
 0x109   :  { %v266_v20 = vadd.f32 %v310_v1, %v265_v18  ;;  %v267_v21 = vpop.f32.mrb[1].mxu1  ;;  %v258_v23 = vadd.f32 %v310_v1, %v257_v19  ;;  %v259_v24 = vpop.f32.mrb[1].mxu0 }
 0x10a   :  { %v268_v25 = vpop.f32.mrb[2].mxu1  ;;  %v260_v26 = vpop.f32.mrb[2].mxu0 }
 0x10b   :  { %281 = vst [vmem:[#allocation2 + $0x10] sm:$0xff] %v266_v20  ;;  %v269_v27 = vadd.f32 %v310_v1, %v268_v25  ;;  %279 = vst [vmem:[#allocation2] sm:$0xff] %v258_v23  ;;  %v270_v22 = vpop.f32.mrb[3].mxu1  ;;  %v261_v28 = vadd.f32 %v310_v1, %v260_v26  ;;  %v262_v29 = vpop.f32.mrb[3].mxu0 }
 0x10d   :  { %282 = vst [vmem:[#allocation2 + $0x18] sm:$0xff] %v269_v27  ;;  %280 = vst [vmem:[#allocation2 + $0x8] sm:$0xff] %v261_v28 }
 0x110   :  { %v273_v30 = vpop.f32.mrb[4].mxu1 }
 0x111   :  { %v274_v31 = vadd.f32 %v310_v1, %v273_v30  ;;  %v275_v32 = vpop.f32.mrb[5].mxu1 }
 0x112   :  { %v276_v33 = vpop.f32.mrb[6].mxu1 }
 0x113   :  { %283 = vst [vmem:[#allocation2 + $0x20] sm:$0xff] %v274_v31  ;;  %v277_v34 = vpop.f32.mrb[7].mxu1 }
 0x114   :  { %421 = shalt.err (!%p418_p4)
}
 0x115   :  { %s422_s8 = scalar_lea.hbm %s614_s3, 640 }
 0x116   :  { %p423_p5 = scmp.ne.s32.totalorder %s614_s3, %s422_s8  ;;  %p426_p6 = scmp.lt.u32.totalorder %s422_s8, %s614_s3 }
 0x118   :  { %p428_p7 = pnand %p426_p6, %p423_p5 }
 0x11a   :  { %431 = shalt.err (!%p428_p7)
}
 0x11b   :  { %s436_s13 = smov 128   ;;  %s437_s14 = smov 8  }
 0x11c   :  { %295 = dma.vmem_to_hbm [thread:$0]  %s290_s5, 640, %s614_s3, [#allocation3], %s436_s13, %s436_s13, %s437_s14  }
 0x11d   :  { %432 = dma.done.wait [#allocation3], 640  }
 0x11e   :  { %433 = vsyncadd [#allocation3], 4294966656 }
 0x11f   :  { %299 = vsyncpa [#allocation3], 1 }

</bundles_post_ra>
